<compile_context>
chip_gen: v6e
topology: v6e:2x2x1
jax: 0.10.0
libtpu: 0.0.40
codegen_flags: <defaults>
</compile_context>

<pallas_src>
import jax
import jax.numpy as jnp
from jax.experimental import pallas as pl
from jax.experimental.pallas import tpu as pltpu

HIDDEN = 32
NUM_HEADS = 4
HEAD_DIM = HIDDEN // NUM_HEADS
FF = 64
SEQ = 8
BATCH = 2
EPS = 1e-5

# MXU operand dtype (accumulation is always f32).  bf16 is MXU-native on
# v5e/v6e/v7x; the f32 reference check below uses a tolerance sized for it.
MXU_DTYPE = jnp.bfloat16

NEG_INF = -1e30
MAX_FOLD_ROWS = 512   # cap on the single-program batch fold (avoids (B*S)^2 blowup)


def _mm(a, b):
    """a @ b on the MXU: bf16 operands, f32 accumulation."""
    return jnp.dot(a.astype(MXU_DTYPE), b.astype(MXU_DTYPE),
                   preferred_element_type=jnp.float32)


def _layernorm(v, gamma, beta):
    mu = jnp.mean(v, axis=-1, keepdims=True)
    var = jnp.mean((v - mu) ** 2, axis=-1, keepdims=True)
    return (v - mu) * jax.lax.rsqrt(var + EPS) * gamma + beta


def _encoder_math(x_rows, bias, wqkv_h, bqkv_h, wo_h, bo,
                  g1, be1, w1, bf1, w2, bf2, g2, be2, *, approx_recip):
    """Shared forward math (used by the Pallas kernel and the plain-JAX mirror)."""
    f32 = jnp.float32
    R, H = x_rows.shape
    three_nh, _, d = wqkv_h.shape
    nh = three_nh // 3

    x32 = x_rows.astype(f32)

    # ---- fused, head-batched QKV projection: heads on a leading axis (no 8-lane slices) ----
    xb = jnp.broadcast_to(x_rows.astype(MXU_DTYPE)[None], (three_nh, R, H))
    qkv = jnp.einsum("hrk,hkd->hrd", xb, wqkv_h.astype(MXU_DTYPE),
                     preferred_element_type=f32) + bqkv_h
    q, k, v = qkv[:nh], qkv[nh:2 * nh], qkv[2 * nh:]   # leading-axis slab slices

    # ---- attention scores for ALL heads in one batched matmul (scale folded into Wq) ----
    s = jnp.einsum("hqd,hkd->hqk", q.astype(MXU_DTYPE), k.astype(MXU_DTYPE),
                   preferred_element_type=f32)
    s = s + bias                      # additive 0 / -1e30 block-diagonal fold mask

    # ---- softmax done ONCE over the stacked (nh, R, R) tensor ----
    s = s - jnp.max(s, axis=-1, keepdims=True)
    p = jnp.exp(s)
    denom = jnp.sum(p, axis=-1, keepdims=True)
    if approx_recip:
        p = p * pl.reciprocal(denom, approx=True)   # EUP slot, off the VALU path
    else:
        p = p / denom

    ctx = jnp.einsum("hqk,hkd->hqd", p.astype(MXU_DTYPE), v.astype(MXU_DTYPE),
                     preferred_element_type=f32)

    # Per-head output projection + head-sum (no lane-dim concat); keep this form
    # only while head_dim < 128 (see TODO above for production head dims).
    proj = jnp.einsum("hrd,hde->hre", ctx.astype(MXU_DTYPE), wo_h.astype(MXU_DTYPE),
                      preferred_element_type=f32)
    attn_out = jnp.sum(proj, axis=0) + bo

    # dropout1 -> identity (eval mode)
    out1 = _layernorm(x32 + attn_out, g1, be1)

    # ---- feed forward ----
    h1 = jnp.maximum(_mm(out1, w1) + bf1, 0.0)
    ffn = _mm(h1, w2) + bf2

    # dropout2 -> identity (eval mode)
    return _layernorm(out1 + ffn, g2, be2)


def encoder_layer_kernel(
    x_ref, bias_ref,                     # (rows, H), (rows, rows) additive mask
    wqkv_ref, bqkv_ref,                  # (3*nh, H, d) bf16, (3*nh, 1, d) f32
    wo_ref, bo_ref,                      # (nh, d, H) bf16, (1, H) f32
    g1_ref, be1_ref,                     # layer_norm1 gamma/beta
    w1_ref, bf1_ref,                     # FFN linear 1: (H, FF) bf16, (1, FF) f32
    w2_ref, bf2_ref,                     # FFN linear 2: (FF, H) bf16, (1, H) f32
    g2_ref, be2_ref,                     # layer_norm2 gamma/beta
    out_ref,                             # (rows, H) f32
):
    out2 = _encoder_math(
        x_ref[...], bias_ref[...],
        wqkv_ref[...], bqkv_ref[...], wo_ref[...], bo_ref[...],
        g1_ref[...], be1_ref[...], w1_ref[...], bf1_ref[...],
        w2_ref[...], bf2_ref[...], g2_ref[...], be2_ref[...],
        approx_recip=True)
    out_ref[...] = out2.astype(out_ref.dtype)


def _single_tensorcore_default():
    # TODO(synk): replace device_kind sniffing with an explicit config knob /
    # TpuInfo query; unrecognized devices fall into the always-correct grid=(B,).
    kind = jax.devices()[0].device_kind.lower().replace(" ", "")
    return any(t in kind for t in ("v5lite", "v5e", "v6lite", "v6e"))


def encoder_layer(x, params, fold_batch=None):
    B, S, H = x.shape
    if fold_batch is None:
        fold_batch = _single_tensorcore_default() and (B * S) <= MAX_FOLD_ROWS
    nb = B if fold_batch else 1          # batches folded per program
    num_programs = B // nb
    rows = nb * S

    x2 = x.reshape(B * S, H)             # free reshape in HBM

    # Precomputed additive attention bias (block-diagonal when batches are folded).
    if nb > 1:
        rb = jnp.arange(rows, dtype=jnp.int32) // S
        bias = jnp.where(rb[:, None] == rb[None, :], 0.0, NEG_INF).astype(jnp.float32)
    else:
        bias = jnp.zeros((rows, rows), jnp.float32)

    weight_order = ["wqkv_h", "bqkv_h", "wo_h", "bo",
                    "g1", "be1", "w1", "bf1", "w2", "bf2", "g2", "be2"]
    weight_args = [params[k] for k in weight_order]

    def full_spec(shape):
        zeros = (0,) * len(shape)
        return pl.BlockSpec(shape, lambda i: zeros)   # constant index -> stays resident

    in_specs = ([pl.BlockSpec((rows, H), lambda i: (i, 0)),
                 full_spec(bias.shape)]
                + [full_spec(w.shape) for w in weight_args])

    # Advisory cost estimate for XLA scheduling around the custom call.
    nh, d = NUM_HEADS, HEAD_DIM
    flops = (2 * B * S * H * 3 * H                              # QKV projection
             + 2 * num_programs * nh * rows * rows * d * 2      # QK^T + PV
             + 2 * B * S * H * H                                # output projection
             + 2 * B * S * H * FF * 2)                          # FFN
    bytes_accessed = (x2.size * x2.dtype.itemsize
                      + bias.size * bias.dtype.itemsize
                      + sum(w.size * w.dtype.itemsize for w in weight_args)
                      + B * S * H * 4)
    cost = pl.CostEstimate(
        flops=int(flops),
        transcendentals=int(num_programs * nh * rows * rows + 4 * B * S),
        bytes_accessed=int(bytes_accessed))

    out2 = pl.pallas_call(
        encoder_layer_kernel,
        out_shape=jax.ShapeDtypeStruct((B * S, H), jnp.float32),
        grid=(num_programs,),
        in_specs=in_specs,
        out_specs=pl.BlockSpec((rows, H), lambda i: (i, 0)),
        compiler_params=pltpu.CompilerParams(
            dimension_semantics=("parallel",),
            vmem_limit_bytes=32 * 1024 * 1024),
        cost_estimate=cost,
    )(x2, bias, *weight_args)
    return out2.reshape(B, S, H)


def make_params(key, hidden, ff):
    """Logical (unfused) parameters, y = x @ W + b convention."""
    ks = jax.random.split(key, 12)
    scale_h = 1.0 / jnp.sqrt(jnp.float32(hidden))
    scale_f = 1.0 / jnp.sqrt(jnp.float32(ff))
    n = jax.random.normal
    return {
        "wq": n(ks[0], (hidden, hidden), jnp.float32) * scale_h,
        "bq": n(ks[1], (1, hidden), jnp.float32) * 0.1,
        "wk": n(ks[2], (hidden, hidden), jnp.float32) * scale_h,
        "bk": n(ks[3], (1, hidden), jnp.float32) * 0.1,
        "wv": n(ks[4], (hidden, hidden), jnp.float32) * scale_h,
        "bv": n(ks[5], (1, hidden), jnp.float32) * 0.1,
        "wo": n(ks[6], (hidden, hidden), jnp.float32) * scale_h,
        "bo": n(ks[7], (1, hidden), jnp.float32) * 0.1,
        "g1": jnp.ones((1, hidden), jnp.float32),
        "be1": jnp.zeros((1, hidden), jnp.float32),
        "w1": n(ks[8], (hidden, ff), jnp.float32) * scale_h,
        "bf1": n(ks[9], (1, ff), jnp.float32) * 0.1,
        "w2": n(ks[10], (ff, hidden), jnp.float32) * scale_f,
        "bf2": n(ks[11], (1, hidden), jnp.float32) * 0.1,
        "g2": jnp.ones((1, hidden), jnp.float32),
        "be2": jnp.zeros((1, hidden), jnp.float32),
    }


def fuse_params(p, num_heads, mxu_dtype=MXU_DTYPE):
    """Host-side, one-time parameter folding:
       * 1/sqrt(head_dim) folded into Wq/bq,
       * per-head weight slabs (heads on the leading axis, no in-kernel slicing),
       * large weights stored in the MXU operand dtype (bf16)."""
    hidden = p["wq"].shape[0]
    d = hidden // num_heads
    scale = 1.0 / jnp.sqrt(jnp.float32(d))

    def heads(w):                       # (H, H) -> (nh, H, d)
        return w.reshape(hidden, num_heads, d).transpose(1, 0, 2)

    def head_bias(b):                   # (1, H) -> (nh, 1, d)
        return b.reshape(num_heads, d)[:, None, :]

    wqkv_h = jnp.concatenate(
        [heads(p["wq"] * scale), heads(p["wk"]), heads(p["wv"])], axis=0)
    bqkv_h = jnp.concatenate(
        [head_bias(p["bq"] * scale), head_bias(p["bk"]), head_bias(p["bv"])], axis=0)
    return {
        "wqkv_h": wqkv_h.astype(mxu_dtype),                       # (3*nh, H, d)
        "bqkv_h": bqkv_h.astype(jnp.float32),                     # (3*nh, 1, d)
        "wo_h": p["wo"].reshape(num_heads, d, hidden).astype(mxu_dtype),
        "bo": p["bo"],
        "g1": p["g1"], "be1": p["be1"],
        "w1": p["w1"].astype(mxu_dtype), "bf1": p["bf1"],
        "w2": p["w2"].astype(mxu_dtype), "bf2": p["bf2"],
        "g2": p["g2"], "be2": p["be2"],
    }


def encoder_layer_mirror(x, fp):
    """Plain-JAX mirror of the kernel's mixed-precision math (same bf16 weights /
    operand casts, exact reciprocal).  Tight wiring check for the Pallas kernel."""
    B, S, H = x.shape
    zero_bias = jnp.zeros((S, S), jnp.float32)

    def one(xb):
        return _encoder_math(xb, zero_bias,
                             fp["wqkv_h"], fp["bqkv_h"], fp["wo_h"], fp["bo"],
                             fp["g1"], fp["be1"], fp["w1"], fp["bf1"],
                             fp["w2"], fp["bf2"], fp["g2"], fp["be2"],
                             approx_recip=False)
    return jax.vmap(one)(x)


def encoder_layer_ref(x, p):
    """Plain-JAX f32 reference (mirrors the PyTorch forward, eval mode)."""
    B, S, H = x.shape
    d = H // NUM_HEADS

    def lin(v, w, b):
        return v @ w + b

    q = lin(x, p["wq"], p["bq"]).reshape(B, S, NUM_HEADS, d).transpose(0, 2, 1, 3)
    k = lin(x, p["wk"], p["bk"]).reshape(B, S, NUM_HEADS, d).transpose(0, 2, 1, 3)
    v = lin(x, p["wv"], p["bv"]).reshape(B, S, NUM_HEADS, d).transpose(0, 2, 1, 3)
    s = jnp.einsum("bhqd,bhkd->bhqk", q, k) / jnp.sqrt(jnp.float32(d))
    pattn = jax.nn.softmax(s, axis=-1)
    o = jnp.einsum("bhqk,bhkd->bhqd", pattn, v).transpose(0, 2, 1, 3).reshape(B, S, H)
    attn_out = lin(o, p["wo"], p["bo"])
    out1 = _layernorm(x + attn_out, p["g1"], p["be1"])
    ffn = lin(jnp.maximum(lin(out1, p["w1"], p["bf1"]), 0.0), p["w2"], p["bf2"])
    return _layernorm(out1 + ffn, p["g2"], p["be2"])


if __name__ == "__main__":
    key = jax.random.PRNGKey(0)
    kx, kp = jax.random.split(key)
    x = jax.random.normal(kx, (BATCH, SEQ, HIDDEN), jnp.float32)

    logical = make_params(kp, HIDDEN, FF)
    fused = fuse_params(logical, NUM_HEADS)

    out = jax.block_until_ready(encoder_layer(x, fused))
    assert out.shape == (BATCH, SEQ, HIDDEN)

    # Tight wiring check: same bf16 operands / f32 accumulation as the kernel
    # (only delta is the approx reciprocal in the softmax).
    mirror = encoder_layer_mirror(x, fused)
    err_mirror = float(jnp.max(jnp.abs(out - mirror)))
    assert jnp.allclose(out, mirror, atol=1e-2, rtol=1e-2), (
        f"wiring mismatch vs mixed-precision mirror (max abs err {err_mirror})")

    # Semantics check vs the pure-f32 PyTorch-style reference; tolerance sized
    # for bf16 MXU operands (+ approx reciprocal) at these shapes.
    ref = encoder_layer_ref(x, logical)
    err_ref = float(jnp.max(jnp.abs(out - ref)))
    assert jnp.allclose(out, ref, atol=6e-2, rtol=6e-2), (
        f"mismatch vs f32 reference (max abs err {err_ref})")

    print("KERNEL_OK")
</pallas_src>

<mosaic_0001>
module attributes {stable_mosaic.version = 11 : i64} {
  func.func @encoder_layer_kernel(%arg0: i32, %arg1: memref<8x32xf32, #tpu.memory_space<vmem>>, %arg2: memref<8x8xf32, #tpu.memory_space<vmem>>, %arg3: memref<12x32x8xbf16, #tpu.memory_space<vmem>>, %arg4: memref<12x1x8xf32, #tpu.memory_space<vmem>>, %arg5: memref<4x8x32xbf16, #tpu.memory_space<vmem>>, %arg6: memref<1x32xf32, #tpu.memory_space<vmem>>, %arg7: memref<1x32xf32, #tpu.memory_space<vmem>>, %arg8: memref<1x32xf32, #tpu.memory_space<vmem>>, %arg9: memref<32x64xbf16, #tpu.memory_space<vmem>>, %arg10: memref<1x64xf32, #tpu.memory_space<vmem>>, %arg11: memref<64x32xbf16, #tpu.memory_space<vmem>>, %arg12: memref<1x32xf32, #tpu.memory_space<vmem>>, %arg13: memref<1x32xf32, #tpu.memory_space<vmem>>, %arg14: memref<1x32xf32, #tpu.memory_space<vmem>>, %arg15: memref<8x32xf32, #tpu.memory_space<vmem>>) attributes {dimension_semantics = [#tpu.dimension_semantics<parallel>], iteration_bounds = array<i64: 2>, scalar_prefetch = 0 : i64, scratch_operands = 0 : i64, tpu.core_type = #tpu.core_type<tc>, window_params = [{transform_indices = @transform_0, window_bounds = array<i64: 8, 32>}, {pipeline_mode = #tpu.pipeline_mode<synchronous>, transform_indices = @transform_1, window_bounds = array<i64: 8, 8>}, {pipeline_mode = #tpu.pipeline_mode<synchronous>, transform_indices = @transform_2, window_bounds = array<i64: 12, 32, 8>}, {pipeline_mode = #tpu.pipeline_mode<synchronous>, transform_indices = @transform_3, window_bounds = array<i64: 12, 1, 8>}, {pipeline_mode = #tpu.pipeline_mode<synchronous>, transform_indices = @transform_4, window_bounds = array<i64: 4, 8, 32>}, {pipeline_mode = #tpu.pipeline_mode<synchronous>, transform_indices = @transform_5, window_bounds = array<i64: 1, 32>}, {pipeline_mode = #tpu.pipeline_mode<synchronous>, transform_indices = @transform_6, window_bounds = array<i64: 1, 32>}, {pipeline_mode = #tpu.pipeline_mode<synchronous>, transform_indices = @transform_7, window_bounds = array<i64: 1, 32>}, {pipeline_mode = #tpu.pipeline_mode<synchronous>, transform_indices = @transform_8, window_bounds = array<i64: 32, 64>}, {pipeline_mode = #tpu.pipeline_mode<synchronous>, transform_indices = @transform_9, window_bounds = array<i64: 1, 64>}, {pipeline_mode = #tpu.pipeline_mode<synchronous>, transform_indices = @transform_10, window_bounds = array<i64: 64, 32>}, {pipeline_mode = #tpu.pipeline_mode<synchronous>, transform_indices = @transform_11, window_bounds = array<i64: 1, 32>}, {pipeline_mode = #tpu.pipeline_mode<synchronous>, transform_indices = @transform_12, window_bounds = array<i64: 1, 32>}, {pipeline_mode = #tpu.pipeline_mode<synchronous>, transform_indices = @transform_13, window_bounds = array<i64: 1, 32>}, {transform_indices = @transform_14, window_bounds = array<i64: 8, 32>}]} {
    %c0 = arith.constant 0 : index
    %c0_0 = arith.constant 0 : index
    %0 = vector.load %arg1[%c0, %c0_0] : memref<8x32xf32, #tpu.memory_space<vmem>>, vector<8x32xf32>
    %c0_1 = arith.constant 0 : index
    %c0_2 = arith.constant 0 : index
    %1 = vector.load %arg2[%c0_1, %c0_2] : memref<8x8xf32, #tpu.memory_space<vmem>>, vector<8x8xf32>
    %c0_3 = arith.constant 0 : index
    %c0_4 = arith.constant 0 : index
    %c0_5 = arith.constant 0 : index
    %2 = vector.load %arg3[%c0_3, %c0_4, %c0_5] : memref<12x32x8xbf16, #tpu.memory_space<vmem>>, vector<12x32x8xbf16>
    %c0_6 = arith.constant 0 : index
    %c0_7 = arith.constant 0 : index
    %c0_8 = arith.constant 0 : index
    %3 = vector.load %arg4[%c0_6, %c0_7, %c0_8] : memref<12x1x8xf32, #tpu.memory_space<vmem>>, vector<12x1x8xf32>
    %c0_9 = arith.constant 0 : index
    %c0_10 = arith.constant 0 : index
    %c0_11 = arith.constant 0 : index
    %4 = vector.load %arg5[%c0_9, %c0_10, %c0_11] : memref<4x8x32xbf16, #tpu.memory_space<vmem>>, vector<4x8x32xbf16>
    %c0_12 = arith.constant 0 : index
    %c0_13 = arith.constant 0 : index
    %5 = vector.load %arg6[%c0_12, %c0_13] : memref<1x32xf32, #tpu.memory_space<vmem>>, vector<1x32xf32>
    %c0_14 = arith.constant 0 : index
    %c0_15 = arith.constant 0 : index
    %6 = vector.load %arg7[%c0_14, %c0_15] : memref<1x32xf32, #tpu.memory_space<vmem>>, vector<1x32xf32>
    %c0_16 = arith.constant 0 : index
    %c0_17 = arith.constant 0 : index
    %7 = vector.load %arg8[%c0_16, %c0_17] : memref<1x32xf32, #tpu.memory_space<vmem>>, vector<1x32xf32>
    %c0_18 = arith.constant 0 : index
    %c0_19 = arith.constant 0 : index
    %8 = vector.load %arg9[%c0_18, %c0_19] : memref<32x64xbf16, #tpu.memory_space<vmem>>, vector<32x64xbf16>
    %c0_20 = arith.constant 0 : index
    %c0_21 = arith.constant 0 : index
    %9 = vector.load %arg10[%c0_20, %c0_21] : memref<1x64xf32, #tpu.memory_space<vmem>>, vector<1x64xf32>
    %c0_22 = arith.constant 0 : index
    %c0_23 = arith.constant 0 : index
    %10 = vector.load %arg11[%c0_22, %c0_23] : memref<64x32xbf16, #tpu.memory_space<vmem>>, vector<64x32xbf16>
    %c0_24 = arith.constant 0 : index
    %c0_25 = arith.constant 0 : index
    %11 = vector.load %arg12[%c0_24, %c0_25] : memref<1x32xf32, #tpu.memory_space<vmem>>, vector<1x32xf32>
    %c0_26 = arith.constant 0 : index
    %c0_27 = arith.constant 0 : index
    %12 = vector.load %arg13[%c0_26, %c0_27] : memref<1x32xf32, #tpu.memory_space<vmem>>, vector<1x32xf32>
    %c0_28 = arith.constant 0 : index
    %c0_29 = arith.constant 0 : index
    %13 = vector.load %arg14[%c0_28, %c0_29] : memref<1x32xf32, #tpu.memory_space<vmem>>, vector<1x32xf32>
    %14 = arith.truncf %0 : vector<8x32xf32> to vector<8x32xbf16>
    %15 = vector.shape_cast %14 : vector<8x32xbf16> to vector<1x8x32xbf16>
    %16 = vector.shape_cast %15 : vector<1x8x32xbf16> to vector<1x8x32xbf16>
    %17 = vector.broadcast %16 : vector<1x8x32xbf16> to vector<12x8x32xbf16>
    "tpu.trace_start"() <{level = 10 : i32, message = "hrk,hkd->hrd"}> : () -> ()
    %cst = arith.constant dense<0.000000e+00> : vector<12x8x8xf32>
    %18 = tpu.matmul %17, %2, %cst {dimension_numbers = #tpu.dot_dimension_numbers<[2], [1], [1], [2], [0, 0, 0, 1, 1, 2], [0], [0]>} : vector<12x8x32xbf16>, vector<12x32x8xbf16>, vector<12x8x8xf32> -> vector<12x8x8xf32>
    "tpu.trace_stop"() : () -> ()
    %19 = vector.broadcast %3 : vector<12x1x8xf32> to vector<12x8x8xf32>
    %20 = arith.addf %18, %19 : vector<12x8x8xf32>
    %21 = vector.extract_strided_slice %20 {offsets = [0, 0, 0], sizes = [4, 8, 8], strides = [1, 1, 1]} : vector<12x8x8xf32> to vector<4x8x8xf32>
    %22 = vector.extract_strided_slice %20 {offsets = [4, 0, 0], sizes = [4, 8, 8], strides = [1, 1, 1]} : vector<12x8x8xf32> to vector<4x8x8xf32>
    %23 = vector.extract_strided_slice %20 {offsets = [8, 0, 0], sizes = [4, 8, 8], strides = [1, 1, 1]} : vector<12x8x8xf32> to vector<4x8x8xf32>
    %24 = arith.truncf %21 : vector<4x8x8xf32> to vector<4x8x8xbf16>
    %25 = arith.truncf %22 : vector<4x8x8xf32> to vector<4x8x8xbf16>
    "tpu.trace_start"() <{level = 10 : i32, message = "hqd,hkd->hqk"}> : () -> ()
    %cst_30 = arith.constant dense<0.000000e+00> : vector<4x8x8xf32>
    %26 = tpu.matmul %24, %25, %cst_30 {dimension_numbers = #tpu.dot_dimension_numbers<[2], [2], [1], [1], [0, 0, 0, 1, 1, 1], [0], [0]>} : vector<4x8x8xbf16>, vector<4x8x8xbf16>, vector<4x8x8xf32> -> vector<4x8x8xf32>
    "tpu.trace_stop"() : () -> ()
    %27 = vector.shape_cast %1 : vector<8x8xf32> to vector<1x8x8xf32>
    %28 = vector.broadcast %27 : vector<1x8x8xf32> to vector<4x8x8xf32>
    %29 = arith.addf %26, %28 : vector<4x8x8xf32>
    %cst_31 = arith.constant dense<0xFF800000> : vector<4x8xf32>
    %30 = vector.multi_reduction <maximumf>, %29, %cst_31 [2] : vector<4x8x8xf32> to vector<4x8xf32>
    %31 = vector.shape_cast %30 : vector<4x8xf32> to vector<4x8x1xf32>
    %32 = vector.broadcast %31 : vector<4x8x1xf32> to vector<4x8x8xf32>
    %33 = arith.subf %29, %32 : vector<4x8x8xf32>
    %34 = math.exp %33 : vector<4x8x8xf32>
    %cst_32 = arith.constant dense<0.000000e+00> : vector<4x8xf32>
    %35 = vector.multi_reduction <add>, %34, %cst_32 [2] : vector<4x8x8xf32> to vector<4x8xf32>
    %36 = vector.shape_cast %35 : vector<4x8xf32> to vector<4x8x1xf32>
    %37 = tpu.reciprocal %36 {approx = true} : vector<4x8x1xf32> -> vector<4x8x1xf32>
    %38 = vector.broadcast %37 : vector<4x8x1xf32> to vector<4x8x8xf32>
    %39 = arith.mulf %34, %38 : vector<4x8x8xf32>
    %40 = arith.truncf %39 : vector<4x8x8xf32> to vector<4x8x8xbf16>
    %41 = arith.truncf %23 : vector<4x8x8xf32> to vector<4x8x8xbf16>
    "tpu.trace_start"() <{level = 10 : i32, message = "hqk,hkd->hqd"}> : () -> ()
    %cst_33 = arith.constant dense<0.000000e+00> : vector<4x8x8xf32>
    %42 = tpu.matmul %40, %41, %cst_33 {dimension_numbers = #tpu.dot_dimension_numbers<[2], [1], [1], [2], [0, 0, 0, 1, 1, 2], [0], [0]>} : vector<4x8x8xbf16>, vector<4x8x8xbf16>, vector<4x8x8xf32> -> vector<4x8x8xf32>
    "tpu.trace_stop"() : () -> ()
    %43 = arith.truncf %42 : vector<4x8x8xf32> to vector<4x8x8xbf16>
    "tpu.trace_start"() <{level = 10 : i32, message = "hrd,hde->hre"}> : () -> ()
    %cst_34 = arith.constant dense<0.000000e+00> : vector<4x8x32xf32>
    %44 = tpu.matmul %43, %4, %cst_34 {dimension_numbers = #tpu.dot_dimension_numbers<[2], [1], [1], [2], [0, 0, 0, 1, 1, 2], [0], [0]>} : vector<4x8x8xbf16>, vector<4x8x32xbf16>, vector<4x8x32xf32> -> vector<4x8x32xf32>
    "tpu.trace_stop"() : () -> ()
    %cst_35 = arith.constant dense<0.000000e+00> : vector<8x32xf32>
    %45 = vector.multi_reduction <add>, %44, %cst_35 [0] : vector<4x8x32xf32> to vector<8x32xf32>
    %46 = vector.broadcast %5 : vector<1x32xf32> to vector<8x32xf32>
    %47 = arith.addf %45, %46 : vector<8x32xf32>
    %48 = arith.addf %0, %47 : vector<8x32xf32>
    %cst_36 = arith.constant dense<0.000000e+00> : vector<8xf32>
    %49 = vector.multi_reduction <add>, %48, %cst_36 [1] : vector<8x32xf32> to vector<8xf32>
    %50 = vector.shape_cast %49 : vector<8xf32> to vector<8x1xf32>
    %cst_37 = arith.constant 3.200000e+01 : f32
    %51 = vector.broadcast %cst_37 : f32 to vector<8x1xf32>
    %52 = arith.divf %50, %51 : vector<8x1xf32>
    %53 = vector.broadcast %52 : vector<8x1xf32> to vector<8x32xf32>
    %54 = arith.subf %48, %53 : vector<8x32xf32>
    %55 = arith.mulf %54, %54 : vector<8x32xf32>
    %cst_38 = arith.constant dense<0.000000e+00> : vector<8xf32>
    %56 = vector.multi_reduction <add>, %55, %cst_38 [1] : vector<8x32xf32> to vector<8xf32>
    %57 = vector.shape_cast %56 : vector<8xf32> to vector<8x1xf32>
    %cst_39 = arith.constant 3.200000e+01 : f32
    %58 = vector.broadcast %cst_39 : f32 to vector<8x1xf32>
    %59 = arith.divf %57, %58 : vector<8x1xf32>
    %60 = vector.broadcast %52 : vector<8x1xf32> to vector<8x32xf32>
    %61 = arith.subf %48, %60 : vector<8x32xf32>
    %cst_40 = arith.constant 9.99999974E-6 : f32
    %62 = vector.broadcast %cst_40 : f32 to vector<8x1xf32>
    %63 = arith.addf %59, %62 : vector<8x1xf32>
    %64 = math.rsqrt %63 : vector<8x1xf32>
    %65 = vector.broadcast %64 : vector<8x1xf32> to vector<8x32xf32>
    %66 = arith.mulf %61, %65 : vector<8x32xf32>
    %67 = vector.broadcast %6 : vector<1x32xf32> to vector<8x32xf32>
    %68 = arith.mulf %66, %67 : vector<8x32xf32>
    %69 = vector.broadcast %7 : vector<1x32xf32> to vector<8x32xf32>
    %70 = arith.addf %68, %69 : vector<8x32xf32>
    %71 = arith.truncf %70 : vector<8x32xf32> to vector<8x32xbf16>
    %cst_41 = arith.constant dense<0.000000e+00> : vector<8x64xf32>
    %72 = tpu.matmul %71, %8, %cst_41 {dimension_numbers = #tpu.dot_dimension_numbers<[1], [0], [0], [1], [0, 0, 1, 1], [], []>} : vector<8x32xbf16>, vector<32x64xbf16>, vector<8x64xf32> -> vector<8x64xf32>
    %73 = vector.broadcast %9 : vector<1x64xf32> to vector<8x64xf32>
    %74 = arith.addf %72, %73 : vector<8x64xf32>
    %cst_42 = arith.constant 0.000000e+00 : f32
    %75 = vector.broadcast %cst_42 : f32 to vector<8x64xf32>
    %76 = arith.maximumf %74, %75 : vector<8x64xf32>
    %77 = arith.truncf %76 : vector<8x64xf32> to vector<8x64xbf16>
    %cst_43 = arith.constant dense<0.000000e+00> : vector<8x32xf32>
    %78 = tpu.matmul %77, %10, %cst_43 {dimension_numbers = #tpu.dot_dimension_numbers<[1], [0], [0], [1], [0, 0, 1, 1], [], []>} : vector<8x64xbf16>, vector<64x32xbf16>, vector<8x32xf32> -> vector<8x32xf32>
    %79 = vector.broadcast %11 : vector<1x32xf32> to vector<8x32xf32>
    %80 = arith.addf %78, %79 : vector<8x32xf32>
    %81 = arith.addf %70, %80 : vector<8x32xf32>
    %cst_44 = arith.constant dense<0.000000e+00> : vector<8xf32>
    %82 = vector.multi_reduction <add>, %81, %cst_44 [1] : vector<8x32xf32> to vector<8xf32>
    %83 = vector.shape_cast %82 : vector<8xf32> to vector<8x1xf32>
    %cst_45 = arith.constant 3.200000e+01 : f32
    %84 = vector.broadcast %cst_45 : f32 to vector<8x1xf32>
    %85 = arith.divf %83, %84 : vector<8x1xf32>
    %86 = vector.broadcast %85 : vector<8x1xf32> to vector<8x32xf32>
    %87 = arith.subf %81, %86 : vector<8x32xf32>
    %88 = arith.mulf %87, %87 : vector<8x32xf32>
    %cst_46 = arith.constant dense<0.000000e+00> : vector<8xf32>
    %89 = vector.multi_reduction <add>, %88, %cst_46 [1] : vector<8x32xf32> to vector<8xf32>
    %90 = vector.shape_cast %89 : vector<8xf32> to vector<8x1xf32>
    %cst_47 = arith.constant 3.200000e+01 : f32
    %91 = vector.broadcast %cst_47 : f32 to vector<8x1xf32>
    %92 = arith.divf %90, %91 : vector<8x1xf32>
    %93 = vector.broadcast %85 : vector<8x1xf32> to vector<8x32xf32>
    %94 = arith.subf %81, %93 : vector<8x32xf32>
    %cst_48 = arith.constant 9.99999974E-6 : f32
    %95 = vector.broadcast %cst_48 : f32 to vector<8x1xf32>
    %96 = arith.addf %92, %95 : vector<8x1xf32>
    %97 = math.rsqrt %96 : vector<8x1xf32>
    %98 = vector.broadcast %97 : vector<8x1xf32> to vector<8x32xf32>
    %99 = arith.mulf %94, %98 : vector<8x32xf32>
    %100 = vector.broadcast %12 : vector<1x32xf32> to vector<8x32xf32>
    %101 = arith.mulf %99, %100 : vector<8x32xf32>
    %102 = vector.broadcast %13 : vector<1x32xf32> to vector<8x32xf32>
    %103 = arith.addf %101, %102 : vector<8x32xf32>
    %c0_49 = arith.constant 0 : index
    %c0_50 = arith.constant 0 : index
    %104 = vector.load %arg15[%c0_49, %c0_50] : memref<8x32xf32, #tpu.memory_space<vmem>>, vector<8x32xf32>
    tpu.vector_store %arg15[%c0_49, %c0_50], %103 {strides = array<i32>} : memref<8x32xf32, #tpu.memory_space<vmem>>, vector<8x32xf32>,
    return
  }
  func.func @transform_0(%arg0: i32) -> (i32, i32) {
    %c0_i32 = arith.constant 0 : i32
    %c0_i32_0 = arith.constant 0 : i32
    return %arg0, %c0_i32 : i32, i32
  }
  func.func @transform_1(%arg0: i32) -> (i32, i32) {
    %c0_i32 = arith.constant 0 : i32
    %c0_i32_0 = arith.constant 0 : i32
    %c0_i32_1 = arith.constant 0 : i32
    return %c0_i32, %c0_i32_0 : i32, i32
  }
  func.func @transform_2(%arg0: i32) -> (i32, i32, i32) {
    %c0_i32 = arith.constant 0 : i32
    %c0_i32_0 = arith.constant 0 : i32
    %c0_i32_1 = arith.constant 0 : i32
    %c0_i32_2 = arith.constant 0 : i32
    return %c0_i32, %c0_i32_0, %c0_i32_1 : i32, i32, i32
  }
  func.func @transform_3(%arg0: i32) -> (i32, i32, i32) {
    %c0_i32 = arith.constant 0 : i32
    %c0_i32_0 = arith.constant 0 : i32
    %c0_i32_1 = arith.constant 0 : i32
    %c0_i32_2 = arith.constant 0 : i32
    return %c0_i32, %c0_i32_0, %c0_i32_1 : i32, i32, i32
  }
  func.func @transform_4(%arg0: i32) -> (i32, i32, i32) {
    %c0_i32 = arith.constant 0 : i32
    %c0_i32_0 = arith.constant 0 : i32
    %c0_i32_1 = arith.constant 0 : i32
    %c0_i32_2 = arith.constant 0 : i32
    return %c0_i32, %c0_i32_0, %c0_i32_1 : i32, i32, i32
  }
  func.func @transform_5(%arg0: i32) -> (i32, i32) {
    %c0_i32 = arith.constant 0 : i32
    %c0_i32_0 = arith.constant 0 : i32
    %c0_i32_1 = arith.constant 0 : i32
    return %c0_i32, %c0_i32_0 : i32, i32
  }
  func.func @transform_6(%arg0: i32) -> (i32, i32) {
    %c0_i32 = arith.constant 0 : i32
    %c0_i32_0 = arith.constant 0 : i32
    %c0_i32_1 = arith.constant 0 : i32
    return %c0_i32, %c0_i32_0 : i32, i32
  }
  func.func @transform_7(%arg0: i32) -> (i32, i32) {
    %c0_i32 = arith.constant 0 : i32
    %c0_i32_0 = arith.constant 0 : i32
    %c0_i32_1 = arith.constant 0 : i32
    return %c0_i32, %c0_i32_0 : i32, i32
  }
  func.func @transform_8(%arg0: i32) -> (i32, i32) {
    %c0_i32 = arith.constant 0 : i32
    %c0_i32_0 = arith.constant 0 : i32
    %c0_i32_1 = arith.constant 0 : i32
    return %c0_i32, %c0_i32_0 : i32, i32
  }
  func.func @transform_9(%arg0: i32) -> (i32, i32) {
    %c0_i32 = arith.constant 0 : i32
    %c0_i32_0 = arith.constant 0 : i32
    %c0_i32_1 = arith.constant 0 : i32
    return %c0_i32, %c0_i32_0 : i32, i32
  }
  func.func @transform_10(%arg0: i32) -> (i32, i32) {
    %c0_i32 = arith.constant 0 : i32
    %c0_i32_0 = arith.constant 0 : i32
    %c0_i32_1 = arith.constant 0 : i32
    return %c0_i32, %c0_i32_0 : i32, i32
  }
  func.func @transform_11(%arg0: i32) -> (i32, i32) {
    %c0_i32 = arith.constant 0 : i32
    %c0_i32_0 = arith.constant 0 : i32
    %c0_i32_1 = arith.constant 0 : i32
    return %c0_i32, %c0_i32_0 : i32, i32
  }
  func.func @transform_12(%arg0: i32) -> (i32, i32) {
    %c0_i32 = arith.constant 0 : i32
    %c0_i32_0 = arith.constant 0 : i32
    %c0_i32_1 = arith.constant 0 : i32
    return %c0_i32, %c0_i32_0 : i32, i32
  }
  func.func @transform_13(%arg0: i32) -> (i32, i32) {
    %c0_i32 = arith.constant 0 : i32
    %c0_i32_0 = arith.constant 0 : i32
    %c0_i32_1 = arith.constant 0 : i32
    return %c0_i32, %c0_i32_0 : i32, i32
  }
  func.func @transform_14(%arg0: i32) -> (i32, i32) {
    %c0_i32 = arith.constant 0 : i32
    %c0_i32_0 = arith.constant 0 : i32
    return %arg0, %c0_i32 : i32, i32
  }
}

</mosaic_0001>

<bundles_post_ra>
// kernel: tpu_custom_call.1
= control target key start
LH: loop header
LB: loop body
LE: loop exit
PB: predicated region body
PF: predicated region fallthrough
CT: control target
= control target key end

     0   :  { %s3145_s0 = inlined_call_operand.vmem [shape: f32[16,32], index: 0, kind: input, shape index: {}]   ;;  %s3146_s1 = inlined_call_operand.vmem [shape: f32[8,8], index: 1, kind: input, shape index: {}]   ;;  %s3147_s2 = inlined_call_operand.vmem [shape: bf16[12,32,8], index: 2, kind: input, shape index: {}]   ;;  %s3148_s3 = inlined_call_operand.vmem [shape: f32[12,1,8], index: 3, kind: input, shape index: {}]   ;;  %s3149_s4 = inlined_call_operand.vmem [shape: bf16[4,8,32], index: 4, kind: input, shape index: {}]   ;;  %s3150_s5 = inlined_call_operand.vmem [shape: f32[1,32], index: 5, kind: input, shape index: {}]   ;;  %s3151_s6 = inlined_call_operand.vmem [shape: f32[1,32], index: 6, kind: input, shape index: {}]   ;;  %s3152_s7 = inlined_call_operand.vmem [shape: f32[1,32], index: 7, kind: input, shape index: {}]   ;;  %s3153_s8 = inlined_call_operand.vmem [shape: bf16[32,64], index: 8, kind: input, shape index: {}]   ;;  %s3154_s9 = inlined_call_operand.vmem [shape: f32[1,64], index: 9, kind: input, shape index: {}]   ;;  %s3155_s10 = inlined_call_operand.vmem [shape: bf16[64,32], index: 10, kind: input, shape index: {}]   ;;  %s3156_s11 = inlined_call_operand.vmem [shape: f32[1,32], index: 11, kind: input, shape index: {}]   ;;  %s3157_s12 = inlined_call_operand.vmem [shape: f32[1,32], index: 12, kind: input, shape index: {}]   ;;  %s3158_s13 = inlined_call_operand.vmem [shape: f32[1,32], index: 13, kind: input, shape index: {}]   ;;  %s3159_s14 = inlined_call_operand.hbm [shape: f32[16,32], index: 14, kind: output, shape index: {}]  }
   0x1   :  { %3161 = sst [smem:[#allocation7_spill]] %s3145_s0 }
   0x2   :  { %3162 = sst [smem:[#allocation8_spill]] %s3146_s1 }
   0x3   :  { %3163 = sst [smem:[#allocation9_spill]] %s3147_s2 }
   0x4   :  { %3164 = sst [smem:[#allocation10_spill]] %s3148_s3 }
   0x5   :  { %19 = vsyncpa [#allocation3], 0 }
   0x6   :  { %21 = vsyncpa [#allocation3 + $0x1], 0  ;;  %s2723_s29 = smov 0   ;;  %s2725_s30 = smov 0  }
   0x7   :  { %s2727_s15 = smov 0   ;;  %s2729_s16 = smov 0  }
   0x8 LB: > { %3165 = sst [smem:[#allocation5_spill]] %s2639_s15  ;;  %s2744_s17 = sadd.s32 4294967295, %s2643_s16   ;;  %s2643_s16 = sphi %s2729_s16, %s3177_s16   ;;  %s2639_s15 = sphi %s2727_s15, %s3174_s15   ;;  %s2635_s30 = sphi %s2725_s30, %s3176_s30   ;;  %s2631_s29 = sphi %s2723_s29, %s3175_s29  }
   0x9   : > { %s2151_s18 = sadd.s32 4294967294, %s2643_s16   ;;  %s2748_s19 = sadd.s32 1, %s2643_s16  }
   0xa   : > { %s333_s20 = sadd.s32 1, %s2639_s15  ;;  %s330_s21 = ssub.s32 %s2643_s16, %s2748_s19 }
   0xb   : > { %p343_p0 = scmp.ne.s32.totalorder %s2639_s15, %s2635_s30  ;;  %p331_p1 = scmp.eq.s32.totalorder %s330_s21, 0 }
   0xc   : > { %p344_p2 = scmp.eq.s32.totalorder %s2744_s17, 1  ;;  %p349_p3 = scmp.ne.s32.totalorder %s2635_s30, %s2631_s29 }
   0xd   : > { %p350_p4 = scmp.eq.s32.totalorder %s2151_s18, 1  ;;  %p2154_p7 = scmp.ge.s32.totalorder %s2643_s16, 1 }
   0xe   : > { %s2759_s22 = scalar_select %p331_p1, %s2639_s15, %s333_s20  }
   0xf   : > { %p2761_p5 = por %p344_p2, %p343_p0  ;;  %p2765_p6 = por %p350_p4, %p349_p3 }
  0x10   : > { %3166 = sst [smem:[#allocation6_spill]] %s2759_s22  ;;  %p414_p8 = scmp.lt.s32.totalorder %s2643_s16, 3 }
  0x12   : > { %p415_p9 = pnand %p2154_p7, %p414_p8 }
  0x13   : > { %s3169_s2 = sld [smem:[#allocation9_spill]] (!%p415_p9)  ;;  %p459_p10 = scmp.lt.s32.totalorder (!%p415_p9), %s2744_s17, 1 }
  0x14   : > { %418 = sbr.rel (%p415_p9) target bundleno = 2198 (0x896), region = 76  ;;  %s3170_s0 = sld [smem:[#allocation7_spill]] (!%p415_p9) }
  0x15   : > { %s3171_s3 = sld [smem:[#allocation10_spill]] (!%p415_p9)  ;;  %s2233_s25 = sshll.u32 (!%p415_p9), %s2744_s17, 7 }
  0x16   : > { %s3172_s1 = sld [smem:[#allocation8_spill]] (!%p415_p9)  ;;  %s2647_s18 = smov (!%p415_p9), [#allocation2]  }
  0x17   : > { %s2587_s20 = sshll.u32 (!%p415_p9), %s2647_s18, 4  ;;  %s2588_s20 = int_to_ptr.vmem [resolvable:$false] %s2587_s20 }
  0x19   : > { %v2533_v0 = vld [vmem:[%s3169_s2 + $0x8] sm:$0xff]   ;;  %v2645_v1 = vmov 0.0   ;;  %v2534_v2 = vld [vmem:[%s3169_s2 + $0x18] sm:$0xff]   ;;  %v2535_v3 = vld [vmem:[%s3169_s2] sm:$0xff]   ;;  %vm2646_vm0 = vmmov 0   ;;  %s460_s26 = scalar_select %p459_p10, %s2744_s17, 1 }
  0x1a   : > { %2304 = vmatprep.subr.bf16.mxu0 %v2645_v1  ;;  %2312 = vmatprep.subr.bf16.mxu1 %v2645_v1  ;;  %v2536_v4 = vld [vmem:[%s3169_s2 + $0x10] sm:$0xff]   ;;  %v2537_v5 = vld [vmem:[%s3169_s2 + $0x28] sm:$0xff]   ;;  %v2538_v6 = vld [vmem:[%s3169_s2 + $0x38] sm:$0xff]   ;;  %vm634_vm1 = vcmask 261120   ;;  %vm1258_vm2 = vcmask 64512   ;;  %vm1498_vm3 = vcmask 1043456  }
  0x1b   : > { %2305 = vmatpush3.bf16.msra.mxu0 %v2533_v0  ;;  %2308 = vmatprep.mubr.msk.bf16.mxu0 %vm2646_vm0, %v2645_v1  ;;  %s2156_s27 = sshll.u32 %s460_s26, 3  ;;  %v2539_v9 = vld [vmem:[%s3169_s2 + $0x20] sm:$0xff]   ;;  %v2540_v10 = vld [vmem:[%s3169_s2 + $0x30] sm:$0xff]   ;;  %v2541_v11 = vld [vmem:[%s3169_s2 + $0x48] sm:$0xff]   ;;  %vm2005_vm4 = vcmask 523264   ;;  %s2589_s17 = scalar_lea.vmem %s2588_s20, 256 }
  0x1c   : > { %2313 = vmatpush3.bf16.msra.mxu1 %v2534_v2  ;;  %2306 = vmatprep.subr.bf16.mxu0 %v2645_v1  ;;  %s462_s15 = scalar_lea.vmem %s3170_s0, %s2156_s27  ;;  %v2542_v12 = vld [vmem:[%s3169_s2 + $0x58] sm:$0xff]   ;;  %v2543_v13 = vld [vmem:[%s3169_s2 + $0x40] sm:$0xff]   ;;  %v2544_v14 = vld [vmem:[%s3169_s2 + $0x50] sm:$0xff]  }
  0x1d   : > { %2314 = vmatprep.subr.bf16.mxu1 %v2645_v1  ;;  %2316 = vmatprep.mubr.msk.bf16.mxu1 %vm2646_vm0, %v2645_v1  ;;  %v2803_v7 = vld [vmem:[%s462_s15] sm:$0xff]  ;;  %v2545_v15 = vld [vmem:[%s3169_s2 + $0x68] sm:$0xff]   ;;  %v2546_v16 = vld [vmem:[%s3169_s2 + $0x78] sm:$0xff]   ;;  %s456_s15 = sand.u32 1, %s2635_s30  }
  0x1e   : > { %v2808_v8 = vpack.c.bf16 %v2803_v7, %v2803_v7  ;;  %v2547_v17 = vld [vmem:[%s3169_s2 + $0x60] sm:$0xff]   ;;  %v2548_v18 = vld [vmem:[%s3169_s2 + $0x70] sm:$0xff]   ;;  %v2549_v19 = vld [vmem:[%s3169_s2 + $0x88] sm:$0xff]   ;;  %s2155_s27 = sshll.u32 %s456_s15, 3 }
  0x1f   : > { %2307 = vmatpush3.bf16.msra.mxu0 %v2535_v3  ;;  %v2550_v20 = vld [vmem:[%s3169_s2 + $0x80] sm:$0xff]   ;;  %v2551_v21 = vld [vmem:[%s3169_s2 + $0x98] sm:$0xff]   ;;  %v2552_v22 = vld [vmem:[%s3169_s2 + $0x90] sm:$0xff]   ;;  %s458_s22 = scalar_lea.vmem [#allocation2], %s2155_s27 }
  0x20   : > { %2315 = vmatpush3.bf16.msra.mxu1 %v2536_v4  ;;  %2320 = vmatprep.subr.bf16.mxu0 %v2645_v1  ;;  %v2553_v23 = vld [vmem:[%s3169_s2 + $0xa8] sm:$0xff]   ;;  %v2554_v24 = vld [vmem:[%s3169_s2 + $0xa0] sm:$0xff]   ;;  %v2555_v25 = vld [vmem:[%s3169_s2 + $0xb8] sm:$0xff]   ;;  %s2092_s26 = sshll.u32 %s458_s22, 4  ;;  %s2093_s26 = int_to_ptr.vmem [resolvable:$true] %s2092_s26 }
  0x21   : > { %2328 = vmatprep.subr.bf16.mxu1 %v2645_v1  ;;  %v2556_v26 = vld [vmem:[%s3169_s2 + $0xb0] sm:$0xff]   ;;  %v2161_v43 = vld [vmem:[%s3171_s3 + $0x4] ss:$0 sm:$0xff]  ;;  %v2162_v44 = vld [vmem:[%s3171_s3 + $0x5] ss:$0 sm:$0xff]  ;;  %s2090_s2 = scalar_lea.hbm %s3159_s14, %s2233_s25  ;;  %s2583_s28 = scalar_lea.vmem %s2093_s26, 128 }
  0x22   : > { %2309 = vmatmul.mubr.msk.bf16.vlgmr.msra.gmra.mxu0 %vm634_vm1, %v2808_v8  ;;  %v2157_v53 = vld [vmem:[%s3171_s3] ss:$0 sm:$0xff]  ;;  %v2158_v54 = vld [vmem:[%s3171_s3 + $0x1] ss:$0 sm:$0xff]  ;;  %v2163_v61 = vld [vmem:[%s3171_s3 + $0x6] ss:$0 sm:$0xff]  ;;  %p2584_p11 = scmp.ne.s32.totalorder %s2093_s26, %s2583_s28  ;;  %p2590_p0 = scmp.lt.s32.totalorder %s2093_s26, %s2588_s20 }
  0x23   : > { %2317 = vmatmul.mubr.msk.bf16.vlgmr.msra.gmra.mxu1 %vm634_vm1, %v2808_v8  ;;  %2321 = vmatpush3.bf16.msra.mxu0 %v2537_v5  ;;  %v2164_v62 = vld [vmem:[%s3171_s3 + $0x7] ss:$0 sm:$0xff]  ;;  %p2591_p1 = scmp.lt.s32.totalorder %s2589_s17, %s2583_s28 }
  0x24   : > { %2329 = vmatpush3.bf16.msra.mxu1 %v2538_v6  ;;  %2322 = vmatprep.subr.bf16.mxu0 %v2645_v1  ;;  %p2585_p12 = pnand %p2584_p11, %p2761_p5 }
  0x25   : > { %2330 = vmatprep.subr.bf16.mxu1 %v2645_v1  ;;  %2324 = vmatprep.mubr.msk.bf16.mxu0 %vm2646_vm0, %v2645_v1  ;;  %p2592_p2 = por %p2591_p1, %p2590_p0 }
  0x26   : > { %2332 = vmatprep.mubr.msk.bf16.mxu1 %vm2646_vm0, %v2645_v1  ;;  %p2586_p13 = pneg %p2585_p12 }
  0x27   : > { %2323 = vmatpush3.bf16.msra.mxu0 %v2539_v9 }
  0x28   : > { %2331 = vmatpush3.bf16.msra.mxu1 %v2540_v10  ;;  %2336 = vmatprep.subr.bf16.mxu0 %v2645_v1  ;;  %p2593_p3 = pnand %p2592_p2, %p2586_p13 }
  0x29   : > { %2344 = vmatprep.subr.bf16.mxu1 %v2645_v1 }
  0x2a   : > { %2325 = vmatmul.mubr.msk.bf16.vlgmr.msra.gmra.mxu0 %vm634_vm1, %v2808_v8 }
  0x2b   : > { %2333 = vmatmul.mubr.msk.bf16.vlgmr.msra.gmra.mxu1 %vm634_vm1, %v2808_v8  ;;  %2337 = vmatpush3.bf16.msra.mxu0 %v2541_v11 }
  0x2c   : > { %2345 = vmatpush3.bf16.msra.mxu1 %v2542_v12  ;;  %2338 = vmatprep.subr.bf16.mxu0 %v2645_v1 }
  0x2d   : > { %2346 = vmatprep.subr.bf16.mxu1 %v2645_v1  ;;  %2340 = vmatprep.mubr.msk.bf16.mxu0 %vm2646_vm0, %v2645_v1 }
  0x2e   : > { %2348 = vmatprep.mubr.msk.bf16.mxu1 %vm2646_vm0, %v2645_v1 }
  0x2f   : > { %2339 = vmatpush3.bf16.msra.mxu0 %v2543_v13  ;;  %v2159_v13 = vld [vmem:[%s3171_s3 + $0x2] ss:$0 sm:$0xff] }
  0x30   : > { %2347 = vmatpush3.bf16.msra.mxu1 %v2544_v14  ;;  %2352 = vmatprep.subr.bf16.mxu0 %v2645_v1  ;;  %v2160_v14 = vld [vmem:[%s3171_s3 + $0x3] ss:$0 sm:$0xff] }
  0x31   : > { %2360 = vmatprep.subr.bf16.mxu1 %v2645_v1 }
  0x32   : > { %2341 = vmatmul.mubr.msk.bf16.vlgmr.msra.gmra.mxu0 %vm634_vm1, %v2808_v8 }
  0x33   : > { %2349 = vmatmul.mubr.msk.bf16.vlgmr.msra.gmra.mxu1 %vm634_vm1, %v2808_v8  ;;  %2353 = vmatpush3.bf16.msra.mxu0 %v2545_v15 }
  0x34   : > { %2361 = vmatpush3.bf16.msra.mxu1 %v2546_v16  ;;  %2354 = vmatprep.subr.bf16.mxu0 %v2645_v1 }
  0x35   : > { %2362 = vmatprep.subr.bf16.mxu1 %v2645_v1  ;;  %2356 = vmatprep.mubr.msk.bf16.mxu0 %vm2646_vm0, %v2645_v1 }
  0x36   : > { %2364 = vmatprep.mubr.msk.bf16.mxu1 %vm2646_vm0, %v2645_v1 }
  0x37   : > { %2355 = vmatpush3.bf16.msra.mxu0 %v2547_v17 }
  0x38   : > { %2363 = vmatpush3.bf16.msra.mxu1 %v2548_v18  ;;  %2368 = vmatprep.subr.bf16.mxu0 %v2645_v1 }
  0x39   : > { %2376 = vmatprep.subr.bf16.mxu1 %v2645_v1 }
  0x3a   : > { %2357 = vmatmul.mubr.msk.bf16.vlgmr.msra.gmra.mxu0 %vm634_vm1, %v2808_v8 }
  0x3b   : > { %2365 = vmatmul.mubr.msk.bf16.vlgmr.msra.gmra.mxu1 %vm634_vm1, %v2808_v8  ;;  %2372 = vmatprep.mubr.msk.bf16.mxu0 %vm2646_vm0, %v2645_v1 }
  0x3c   : > { %2380 = vmatprep.mubr.msk.bf16.mxu1 %vm2646_vm0, %v2645_v1  ;;  %2369 = vmatpush3.bf16.msra.mxu0 %v2549_v19 }
  0x3d   : > { %2370 = vmatprep.subr.bf16.mxu0 %v2645_v1  ;;  %2377 = vmatpush3.bf16.msra.mxu1 %v2551_v21 }
  0x3e   : > { %2378 = vmatprep.subr.bf16.mxu1 %v2645_v1 }
  0x40   : > { %2371 = vmatpush3.bf16.msra.mxu0 %v2550_v20 }
  0x41   : > { %2384 = vmatprep.subr.bf16.mxu0 %v2645_v1  ;;  %2379 = vmatpush3.bf16.msra.mxu1 %v2552_v22 }
  0x42   : > { %2392 = vmatprep.subr.bf16.mxu1 %v2645_v1 }
  0x43   : > { %2373 = vmatmul.mubr.msk.bf16.vlgmr.msra.gmra.mxu0 %vm634_vm1, %v2808_v8 }
  0x44   : > { %2385 = vmatpush3.bf16.msra.mxu0 %v2553_v23  ;;  %2388 = vmatprep.mubr.msk.bf16.mxu0 %vm2646_vm0, %v2645_v1 }
  0x45   : > { %2386 = vmatprep.subr.bf16.mxu0 %v2645_v1  ;;  %2381 = vmatmul.mubr.msk.bf16.vlgmr.msra.gmra.mxu1 %vm634_vm1, %v2808_v8 }
  0x46   : > { %2393 = vmatpush3.bf16.msra.mxu1 %v2555_v25  ;;  %2396 = vmatprep.mubr.msk.bf16.mxu1 %vm2646_vm0, %v2645_v1  ;;  %v2165_v25 = vld [vmem:[%s3171_s3 + $0x8] ss:$0 sm:$0xff] }
  0x47   : > { %2394 = vmatprep.subr.bf16.mxu1 %v2645_v1 }
  0x48   : > { %2387 = vmatpush3.bf16.msra.mxu0 %v2554_v24 }
  0x49   : > { %2400 = vmatprep.subr.bf16.mxu0 %v2645_v1 }
  0x4a   : > { %2395 = vmatpush3.bf16.msra.mxu1 %v2556_v26 }
  0x4b   : > { %2389 = vmatmul.mubr.msk.bf16.vlgmr.msra.gmra.mxu0 %vm634_vm1, %v2808_v8  ;;  %2406 = vmatprep.subr.bf16.mxu1 %v2645_v1 }
  0x4c   : > { %2402 = vmatprep.mubr.msk.bf16.mxu0 %vm2646_vm0, %v2645_v1 }
  0x4d   : > { %2397 = vmatmul.mubr.msk.bf16.vlgmr.msra.gmra.mxu1 %vm634_vm1, %v2808_v8 }
  0x4e   : > { %2408 = vmatprep.mubr.msk.bf16.mxu1 %vm2646_vm0, %v2645_v1 }
  0xe2   : > { %v672_v27 = vpop.f32.mrf.mxu0 }
  0xe3   : > { %v724_v28 = vpop.f32.mrf.mxu1  ;;  %v673_v63 = vadd.f32 %v2157_v53, %v672_v27 }
  0xe4   : > { %v2310_v29 = vpop.f32.mrf.mxu0  ;;  %v725_v0 = vadd.f32 %v2158_v54, %v724_v28 }
  0xe5   : > { %v2318_v30 = vpop.f32.mrf.mxu1  ;;  %v1250_v9 = vpack.c.bf16 %v673_v63, %v673_v63  ;;  %v2166_v29 = vld [vmem:[%s3171_s3 + $0x9] ss:$0 sm:$0xff] }
  0xe6   : > { %v675_v31 = vpop.f32.mrf.mxu0  ;;  %v1251_v10 = vpack.c.bf16 %v725_v0, %v725_v0 }
  0xe7   : > { %v727_v32 = vpop.f32.mrf.mxu1 }
  0xe8   : > { %v2311_v33 = vpop.f32.mrf.mxu0 }
  0xe9   : > { %v2319_v34 = vpop.f32.mrf.mxu1 }
  0xea   : > { %v776_v35 = vpop.f32.mrf.mxu0 }
  0xeb   : > { %v828_v36 = vpop.f32.mrf.mxu1  ;;  %v777_v21 = vadd.f32 %v2159_v13, %v776_v35 }
  0xec   : > { %v2326_v37 = vpop.f32.mrf.mxu0  ;;  %v829_v22 = vadd.f32 %v2160_v14, %v828_v36 }
  0xed   : > { %v2334_v38 = vpop.f32.mrf.mxu1  ;;  %v1252_v23 = vpack.c.bf16 %v777_v21, %v777_v21 }
  0xee   : > { %v779_v39 = vpop.f32.mrf.mxu0  ;;  %v1253_v24 = vpack.c.bf16 %v829_v22, %v829_v22 }
  0xef   : > { %v831_v40 = vpop.f32.mrf.mxu1 }
  0xf0   : > { %v2327_v41 = vpop.f32.mrf.mxu0 }
  0xf1   : > { %v2335_v42 = vpop.f32.mrf.mxu1 }
  0xf2   : > { %v880_v45 = vpop.f32.mrf.mxu0 }
  0xf3   : > { %v932_v46 = vpop.f32.mrf.mxu1  ;;  %v881_v47 = vadd.f32 %v2161_v43, %v880_v45 }
  0xf4   : > { %v933_v48 = vadd.f32 %v2162_v44, %v932_v46  ;;  %v2342_v49 = vpop.f32.mrf.mxu0 }
  0xf5   : > { %v2350_v50 = vpop.f32.mrf.mxu1  ;;  %v1254_v51 = vpack.c.bf16 %v881_v47, %v881_v47  ;;  %v465_v49 = vld [vmem:[%s3172_s1] sm:$0xff] }
  0xf6   : > { %v1255_v52 = vpack.c.bf16 %v933_v48, %v933_v48  ;;  %v883_v55 = vpop.f32.mrf.mxu0 }
  0xf7   : > { %v935_v56 = vpop.f32.mrf.mxu1  ;;  %v1263_v57 = vsel %vm1258_vm2, %v1254_v51, 0 }
  0xf8   : > { %v1309_v58 = vsel %vm1258_vm2, %v1255_v52, 0  ;;  %v2343_v59 = vpop.f32.mrf.mxu0  ;;  %2401 = vmatpush3.bf16.xpose.msra.mxu0 %v1263_v57 }
  0xf9   : > { %v2351_v60 = vpop.f32.mrf.mxu1  ;;  %2407 = vmatpush3.bf16.xpose.msra.mxu1 %v1309_v58  ;;  %2412 = vmatprep.subr.bf16.mxu0 %v2645_v1 }
  0xfa   : > { %2418 = vmatprep.subr.bf16.mxu1 %v2645_v1  ;;  %v984_v2 = vpop.f32.mrf.mxu0 }
  0xfb   : > { %v1036_v3 = vpop.f32.mrf.mxu1  ;;  %v985_v4 = vadd.f32 %v2163_v61, %v984_v2 }
  0xfc   : > { %v1037_v5 = vadd.f32 %v2164_v62, %v1036_v3  ;;  %v2358_v6 = vpop.f32.mrf.mxu0 }
  0xfd   : > { %v2366_v8 = vpop.f32.mrf.mxu1  ;;  %v1256_v11 = vpack.c.bf16 %v985_v4, %v985_v4 }
  0xfe   : > { %v1257_v12 = vpack.c.bf16 %v1037_v5, %v1037_v5  ;;  %v987_v15 = vpop.f32.mrf.mxu0 }
  0xff   : > { %v1039_v16 = vpop.f32.mrf.mxu1  ;;  %v1355_v17 = vsel %vm1258_vm2, %v1256_v11, 0  ;;  %2403 = vmatmul.mubr.msk.bf16.vlgmr.msra.gmra.mxu0 %vm1258_vm2, %v1250_v9 }
 0x100   : > { %v1401_v18 = vsel %vm1258_vm2, %v1257_v12, 0  ;;  %2409 = vmatmul.mubr.msk.bf16.vlgmr.msra.gmra.mxu1 %vm1258_vm2, %v1251_v10  ;;  %v2359_v19 = vpop.f32.mrf.mxu0  ;;  %2413 = vmatpush3.bf16.xpose.msra.mxu0 %v1355_v17 }
 0x101   : > { %v2367_v20 = vpop.f32.mrf.mxu1  ;;  %2419 = vmatpush3.bf16.xpose.msra.mxu1 %v1401_v18  ;;  %2414 = vmatprep.mubr.msk.bf16.mxu0 %vm2646_vm0, %v2645_v1 }
 0x102   : > { %2420 = vmatprep.mubr.msk.bf16.mxu1 %vm2646_vm0, %v2645_v1  ;;  %2424 = vmatprep.subr.bf16.mxu0 %v2645_v1 }
 0x103   : > { %2430 = vmatprep.subr.bf16.mxu1 %v2645_v1  ;;  %v1088_v26 = vpop.f32.mrf.mxu0 }
 0x104   : > { %v1089_v27 = vadd.f32 %v2165_v25, %v1088_v26 }
 0x105   : > { %v2374_v28 = vpop.f32.mrf.mxu0  ;;  %v1140_v32 = vpop.f32.mrf.mxu1 }
 0x106   : > { %v1491_v30 = vpack.c.bf16 %v1089_v27, %v1089_v27  ;;  %v1141_v34 = vadd.f32 %v2166_v29, %v1140_v32 }
 0x107   : > { %2415 = vmatmul.mubr.msk.bf16.vlgmr.msra.gmra.mxu0 %vm1258_vm2, %v1252_v23  ;;  %v1091_v31 = vpop.f32.mrf.mxu0  ;;  %v2382_v36 = vpop.f32.mrf.mxu1 }
 0x108   : > { %2421 = vmatmul.mubr.msk.bf16.vlgmr.msra.gmra.mxu1 %vm1258_vm2, %v1253_v24  ;;  %2426 = vmatprep.mubr.msk.bf16.mxu0 %vm2646_vm0, %v2645_v1  ;;  %v1500_v33 = vsel %vm1498_vm3, %v1491_v30, 0  ;;  %v1492_v37 = vpack.c.bf16 %v1141_v34, %v1141_v34  ;;  %v2167_v34 = vld [vmem:[%s3171_s3 + $0xa] ss:$0 sm:$0xff] }
 0x109   : > { %2432 = vmatprep.mubr.msk.bf16.mxu1 %vm2646_vm0, %v2645_v1  ;;  %v2375_v35 = vpop.f32.mrf.mxu0  ;;  %2425 = vmatpush3.bf16.msra.mxu0 %v1500_v33  ;;  %v1143_v38 = vpop.f32.mrf.mxu1 }
 0x10a   : > { %2436 = vmatprep.subr.bf16.mxu0 %v2645_v1  ;;  %v1546_v40 = vsel %vm1498_vm3, %v1492_v37, 0  ;;  %v2168_v37 = vld [vmem:[%s3171_s3 + $0xb] ss:$0 sm:$0xff]  ;;  %s2079_s3 = scalar_lea.sflag [#allocation3], %s456_s15 }
 0x10b   : > { %v2984_v39 = vpop.f32.mrf.mxu0  ;;  %v2383_v41 = vpop.f32.mrf.mxu1  ;;  %2431 = vmatpush3.bf16.msra.mxu1 %v1546_v40 }
 0x10c   : > { %2442 = vmatprep.subr.bf16.mxu1 %v2645_v1  ;;  %v1193_v36 = vadd.f32 %v2167_v34, %v2984_v39 }
 0x10d   : > { %v2390_v42 = vpop.f32.mrf.mxu0  ;;  %v2988_v44 = vpop.f32.mrf.mxu1 }
 0x10e   : > { %v1493_v41 = vpack.c.bf16 %v1193_v36, %v1193_v36  ;;  %v1245_v42 = vadd.f32 %v2168_v37, %v2988_v44  ;;  %v526_v44 = vld [vmem:[%s3149_s4] sm:$0xf] }
 0x10f   : > { %v1195_v43 = vpop.f32.mrf.mxu0  ;;  %v2398_v46 = vpop.f32.mrf.mxu1 }
 0x111   : > { %v2391_v45 = vpop.f32.mrf.mxu0  ;;  %v1247_v47 = vpop.f32.mrf.mxu1 }
 0x112   : > { %v1592_v47 = vsel %vm1498_vm3, %v1493_v41, 0 }
 0x113   : > { %v2399_v48 = vpop.f32.mrf.mxu1 }
 0x114   : > { %v1494_v48 = vpack.c.bf16 %v1245_v42, %v1245_v42 }
 0x1bf   : > { %v1299_v50 = vpop.f32.mrf.mxu0 }
 0x1c0   : > { %v1345_v51 = vpop.f32.mrf.mxu1  ;;  %v1300_v52 = vadd.f32 %v1299_v50, %v465_v49 }
 0x1c1   : > { %v2404_v53 = vpop.f32.mrf.mxu0  ;;  %v1346_v55 = vadd.f32 %v1345_v51, %v465_v49  ;;  %v1638_v51 = vsel %vm1498_vm3, %v1494_v48, 0 }
 0x1c2   : > { %v2410_v54 = vpop.f32.mrf.mxu1  ;;  %v1443_v56 = vsel %vm1258_vm2, %v1300_v52, -inf }
 0x1c3   : > { %1444 = vmax.xlane.f32.xlu0 %v1443_v56  ;;  %v1302_v58 = vpop.f32.mrf.mxu0  ;;  %v1446_v61 = vsel %vm1258_vm2, %v1346_v55, -inf  ;;  %v1688_v54 = vsel %vm1498_vm3, %v526_v44, 0 }
 0x1c4   : > { %v1348_v57 = vpop.f32.mrf.mxu1  ;;  %v527_v58 = vld [vmem:[%s3149_s4 + $0x4] sm:$0xf] }
 0x1c5   : > { %v2405_v59 = vpop.f32.mrf.mxu0 }
 0x1c6   : > { %v2411_v60 = vpop.f32.mrf.mxu1  ;;  %v1734_v59 = vsel %vm1498_vm3, %v527_v58, 0 }
 0x1c7   : > { %1447 = vmax.xlane.f32.xlu0 %v1446_v61  ;;  %v1391_v63 = vpop.f32.mrf.mxu0  ;;  %v528_v60 = vld [vmem:[%s3149_s4 + $0x8] sm:$0xf] }
 0x1c8   : > { %v1437_v62 = vpop.f32.mrf.mxu1  ;;  %v1392_v0 = vadd.f32 %v1391_v63, %v465_v49  ;;  %v1780_v63 = vsel %vm1498_vm3, %v528_v60, 0 }
 0x1c9   : > { %v2416_v2 = vpop.f32.mrf.mxu0  ;;  %v1438_v4 = vadd.f32 %v1437_v62, %v465_v49 }
 0x1ca   : > { %v2422_v3 = vpop.f32.mrf.mxu1  ;;  %v1449_v5 = vsel %vm1258_vm2, %v1392_v0, -inf  ;;  %v529_v2 = vld [vmem:[%s3149_s4 + $0xc] sm:$0xf] }
 0x1cb   : > { %1450 = vmax.xlane.f32.xlu1 %v1449_v5  ;;  %v1394_v8 = vpop.f32.mrf.mxu0  ;;  %v1452_v11 = vsel %vm1258_vm2, %v1438_v4, -inf }
 0x1cc   : > { %v1440_v6 = vpop.f32.mrf.mxu1 }
 0x1cd   : > { %v2417_v9 = vpop.f32.mrf.mxu0  ;;  %v1826_v6 = vsel %vm1498_vm3, %v529_v2, 0 }
 0x1ce   : > { %v2423_v10 = vpop.f32.mrf.mxu1 }
 0x1cf   : > { %1453 = vmax.xlane.f32.xlu1 %v1452_v11 }
 0x24c   : > { %v1445_v12 = vpop.xlane.xlu0 %1444 }
 0x24d   : > { %v1455_v13 = vsub.f32 %v1300_v52, %v1445_v12 }
 0x24f   : > { %v1459_v14 = vmul.f32 1.442695, %v1455_v13 }
 0x250   : > { %v1448_v15 = vpop.xlane.xlu0 %1447 }
 0x251   : > { %2563 = vpow2.f32 %v1459_v14  ;;  %v1456_v16 = vsub.f32 %v1346_v55, %v1448_v15 }
 0x253   : > { %v1461_v17 = vmul.f32 1.442695, %v1456_v16 }
 0x254   : > { %v1451_v18 = vpop.xlane.xlu1 %1450 }
 0x255   : > { %2565 = vpow2.f32 %v1461_v17  ;;  %v1457_v19 = vsub.f32 %v1392_v0, %v1451_v18 }
 0x257   : > { %v1463_v20 = vmul.f32 1.442695, %v1457_v19 }
 0x258   : > { %v1454_v21 = vpop.xlane.xlu1 %1453 }
 0x259   : > { %2567 = vpow2.f32 %v1463_v20  ;;  %v1458_v22 = vsub.f32 %v1438_v4, %v1454_v21 }
 0x25b   : > { %v1465_v23 = vmul.f32 1.442695, %v1458_v22 }
 0x25d   : > { %2569 = vpow2.f32 %v1465_v23 }
 0x25e   : > { %v2564_v24 = vpop.eup %2563 }
 0x25f   : > { %v1467_v25 = vsel %vm1258_vm2, %v2564_v24, 0.0 }
 0x260   : > { %1468 = vadd.xlane.f32.xlu0 %v1467_v25 }
 0x262   : > { %v2566_v26 = vpop.eup %2565 }
 0x263   : > { %v1470_v27 = vsel %vm1258_vm2, %v2566_v26, 0.0 }
 0x264   : > { %1471 = vadd.xlane.f32.xlu1 %v1470_v27 }
 0x266   : > { %v2568_v28 = vpop.eup %2567 }
 0x267   : > { %v1473_v29 = vsel %vm1258_vm2, %v2568_v28, 0.0 }
 0x268   : > { %1474 = vadd.xlane.f32.xlu0 %v1473_v29 }
 0x26a   : > { %v2570_v30 = vpop.eup %2569 }
 0x26b   : > { %v1476_v31 = vsel %vm1258_vm2, %v2570_v30, 0.0 }
 0x26c   : > { %1477 = vadd.xlane.f32.xlu1 %v1476_v31 }
 0x2e9   : > { %v1469_v32 = vpop.xlane.xlu0 %1468 }
 0x2ea   : > { %2571 = vrcp.f32 %v1469_v32 }
 0x2ed   : > { %v1472_v33 = vpop.xlane.xlu1 %1471 }
 0x2ee   : > { %2573 = vrcp.f32 %v1472_v33 }
 0x2f1   : > { %v1475_v35 = vpop.xlane.xlu0 %1474 }
 0x2f2   : > { %2575 = vrcp.f32 %v1475_v35 }
 0x2f5   : > { %v1478_v38 = vpop.xlane.xlu1 %1477 }
 0x2f6   : > { %2577 = vrcp.f32 %v1478_v38 }
 0x2f7   : > { %v2572_v40 = vpop.eup %2571 }
 0x2f8   : > { %v1483_v43 = vmul.f32 %v2572_v40, %v2564_v24  ;;  %v2217_v40 = vld [vmem:[%s3150_s5] ss:$0 sm:$0xff] }
 0x2fa   : > { %v1487_v45 = vpack.c.bf16 %v1483_v43, %v1483_v43 }
 0x2fb   : > { %v2574_v46 = vpop.eup %2573 }
 0x2fc   : > { %2427 = vmatmul.mubr.msk.bf16.vlgmr.msra.gmra.mxu0 %vm1258_vm2, %v1487_v45  ;;  %v1484_v49 = vmul.f32 %v2574_v46, %v2566_v26 }
 0x2fd   : > { %2437 = vmatpush3.bf16.msra.mxu0 %v1592_v47  ;;  %2438 = vmatprep.mubr.msk.bf16.mxu0 %vm2646_vm0, %v2645_v1 }
 0x2fe   : > { %v1488_v39 = vpack.c.bf16 %v1484_v49, %v1484_v49  ;;  %2448 = vmatprep.subr.bf16.mxu0 %v2645_v1 }
 0x2ff   : > { %v2576_v50 = vpop.eup %2575 }
 0x300   : > { %2433 = vmatmul.mubr.msk.bf16.vlgmr.msra.gmra.mxu1 %vm1258_vm2, %v1488_v39  ;;  %v1485_v52 = vmul.f32 %v2576_v50, %v2568_v28 }
 0x301   : > { %2443 = vmatpush3.bf16.msra.mxu1 %v1638_v51  ;;  %2444 = vmatprep.mubr.msk.bf16.mxu1 %vm2646_vm0, %v2645_v1 }
 0x302   : > { %v1489_v53 = vpack.c.bf16 %v1485_v52, %v1485_v52  ;;  %2454 = vmatprep.subr.bf16.mxu1 %v2645_v1 }
 0x303   : > { %v2578_v55 = vpop.eup %2577 }
 0x304   : > { %2439 = vmatmul.mubr.msk.bf16.vlgmr.msra.gmra.mxu0 %vm1258_vm2, %v1489_v53  ;;  %v1486_v56 = vmul.f32 %v2578_v55, %v2570_v30  ;;  %v2558_v55 = vld [vmem:[%s3153_s8] sm:$0xff]  }
 0x305   : > { %2449 = vmatpush3.bf16.msra.mxu0 %v1688_v54  ;;  %2450 = vmatprep.mubr.msk.bf16.mxu0 %vm2646_vm0, %v2645_v1  ;;  %v2557_v54 = vld [vmem:[%s3153_s8 + $0x8] sm:$0xff]  }
 0x306   : > { %v1490_v57 = vpack.c.bf16 %v1486_v56, %v1486_v56  ;;  %2460 = vmatprep.subr.bf16.mxu0 %v2645_v1  ;;  %v2560_v56 = vld [vmem:[%s3155_s10 + $0x10] sm:$0xff]  }
 0x308   : > { %2445 = vmatmul.mubr.msk.bf16.vlgmr.msra.gmra.mxu1 %vm1258_vm2, %v1490_v57 }
 0x309   : > { %2456 = vmatprep.mubr.msk.bf16.mxu1 %vm2646_vm0, %v2645_v1  ;;  %2455 = vmatpush3.bf16.msra.mxu1 %v1734_v59 }
 0x30a   : > { %2466 = vmatprep.subr.bf16.mxu1 %v2645_v1 }
 0x3bc   : > { %v1536_v61 = vpop.f32.mrf.mxu0 }
 0x3bd   : > { %v1680_v62 = vpack.c.bf16 %v1536_v61, %v1536_v61  ;;  %v2218_v61 = vld [vmem:[%s3151_s6] ss:$0 sm:$0xff] }
 0x3be   : > { %v2428_v0 = vpop.f32.mrf.mxu0 }
 0x3bf   : > { %2451 = vmatmul.mubr.msk.bf16.vlgmr.msra.gmra.mxu0 %vm1258_vm2, %v1680_v62 }
 0x3c0   : > { %v1539_v3 = vpop.f32.mrf.mxu0  ;;  %v1582_v4 = vpop.f32.mrf.mxu1  ;;  %2461 = vmatpush3.bf16.msra.mxu0 %v1780_v63  ;;  %2462 = vmatprep.mubr.msk.bf16.mxu0 %vm2646_vm0, %v2645_v1  ;;  %v2219_v63 = vld [vmem:[%s3152_s7] ss:$0 sm:$0xff] }
 0x3c1   : > { %v1681_v5 = vpack.c.bf16 %v1582_v4, %v1582_v4  ;;  %2472 = vmatprep.subr.bf16.mxu0 %v2645_v1  ;;  %v2561_v4 = vld [vmem:[%s3155_s10 + $0x8] sm:$0xff]  }
 0x3c2   : > { %v2429_v8 = vpop.f32.mrf.mxu0  ;;  %v2434_v9 = vpop.f32.mrf.mxu1 }
 0x3c3   : > { %2457 = vmatmul.mubr.msk.bf16.vlgmr.msra.gmra.mxu1 %vm1258_vm2, %v1681_v5  ;;  %v2562_v5 = vld [vmem:[%s3155_s10] sm:$0xff]  }
 0x3c4   : > { %v1585_v10 = vpop.f32.mrf.mxu1  ;;  %v1628_v11 = vpop.f32.mrf.mxu0  ;;  %2467 = vmatpush3.bf16.msra.mxu1 %v1826_v6  ;;  %2468 = vmatprep.mubr.msk.bf16.mxu1 %vm2646_vm0, %v2645_v1  ;;  %v2220_v6 = vld [vmem:[%s3154_s9] ss:$0 sm:$0xff] }
 0x3c5   : > { %v1682_v12 = vpack.c.bf16 %v1628_v11, %v1628_v11  ;;  %2480 = vmatprep.subr.bf16.mxu1 %v2645_v1 }
 0x3c6   : > { %v2435_v13 = vpop.f32.mrf.mxu1  ;;  %v2440_v14 = vpop.f32.mrf.mxu0 }
 0x3c7   : > { %2463 = vmatmul.mubr.msk.bf16.vlgmr.msra.gmra.mxu0 %vm1258_vm2, %v1682_v12 }
 0x3c8   : > { %v1631_v15 = vpop.f32.mrf.mxu0  ;;  %v1674_v16 = vpop.f32.mrf.mxu1  ;;  %2476 = vmatprep.mubr.msk.bf16.mxu0 %vm2646_vm0, %v2645_v1  ;;  %2473 = vmatpush3.bf16.msra.mxu0 %v2557_v54 }
 0x3c9   : > { %v1683_v17 = vpack.c.bf16 %v1674_v16, %v1674_v16  ;;  %2474 = vmatprep.subr.bf16.mxu0 %v2645_v1 }
 0x3ca   : > { %v2441_v18 = vpop.f32.mrf.mxu0  ;;  %v2446_v19 = vpop.f32.mrf.mxu1 }
 0x3cb   : > { %2469 = vmatmul.mubr.msk.bf16.vlgmr.msra.gmra.mxu1 %vm1258_vm2, %v1683_v17 }
 0x3cc   : > { %v1677_v20 = vpop.f32.mrf.mxu1  ;;  %2488 = vmatprep.mubr.msk.bf16.mxu1 %vm2646_vm0, %v2645_v1  ;;  %2475 = vmatpush3.bf16.msra.mxu0 %v2558_v55 }
 0x3ce   : > { %v2447_v21 = vpop.f32.mrf.mxu1 }
 0x47f   : > { %v1724_v22 = vpop.f32.mrf.mxu0 }
 0x480   : > { %v1868_v31 = vsel %vm634_vm1, %v1724_v22, 0.0 }
 0x481   : > { %v2452_v23 = vpop.f32.mrf.mxu0 }
 0x483   : > { %v1727_v24 = vpop.f32.mrf.mxu0  ;;  %v1770_v25 = vpop.f32.mrf.mxu1 }
 0x484   : > { %v1869_v28 = vsel %vm634_vm1, %v1770_v25, 0.0 }
 0x485   : > { %v2453_v26 = vpop.f32.mrf.mxu0  ;;  %v2458_v27 = vpop.f32.mrf.mxu1  ;;  %v1870_v33 = vadd.f32 %v1869_v28, %v1868_v31  ;;  %v2230_v31 = vld [vmem:[%s3157_s12] ss:$0 sm:$0xff] }
 0x487   : > { %v1773_v29 = vpop.f32.mrf.mxu1  ;;  %v1816_v30 = vpop.f32.mrf.mxu0 }
 0x488   : > { %v1871_v32 = vsel %vm634_vm1, %v1816_v30, 0.0 }
 0x489   : > { %v2459_v34 = vpop.f32.mrf.mxu1  ;;  %v2464_v35 = vpop.f32.mrf.mxu0  ;;  %v1872_v36 = vadd.f32 %v1871_v32, %v1870_v33  ;;  %v2231_v33 = vld [vmem:[%s3158_s13] ss:$0 sm:$0xff] }
 0x48b   : > { %v1819_v37 = vpop.f32.mrf.mxu0  ;;  %v1862_v38 = vpop.f32.mrf.mxu1 }
 0x48c   : > { %v1873_v41 = vsel %vm634_vm1, %v1862_v38, 0.0 }
 0x48d   : > { %v1874_v42 = vadd.f32 %v1873_v41, %v1872_v36  ;;  %v2465_v43 = vpop.f32.mrf.mxu0  ;;  %v2470_v45 = vpop.f32.mrf.mxu1 }
 0x48f   : > { %v1881_v46 = vadd.f32 %v2217_v40, %v1874_v42  ;;  %v1865_v47 = vpop.f32.mrf.mxu1 }
 0x491   : > { %v2471_v48 = vpop.f32.mrf.mxu1  ;;  %v1882_v49 = vadd.f32 %v1881_v46, %v2803_v7  ;;  %v2559_v7 = vld [vmem:[%s3155_s10 + $0x18] sm:$0xff]  }
 0x492   : > { %2481 = vmatpush3.bf16.msra.mxu1 %v2559_v7 }
 0x493   : > { %v1883_v39 = vsel %vm634_vm1, %v1882_v49, 0.0  ;;  %2482 = vmatprep.subr.bf16.mxu1 %v2645_v1 }
 0x494   : > { %1884 = vadd.xlane.f32.xlu0 %v1883_v39 }
 0x496   : > { %2483 = vmatpush3.bf16.msra.mxu1 %v2560_v56 }
 0x497   : > { %2484 = vmatprep.subr.bf16.mxu1 %v2645_v1 }
 0x49a   : > { %2485 = vmatpush3.bf16.msra.mxu1 %v2561_v4 }
 0x49b   : > { %2486 = vmatprep.subr.bf16.mxu1 %v2645_v1  ;;  %v2224_v1 = vld [vmem:[%s3156_s11] ss:$0 sm:$0xff] }
 0x49e   : > { %2487 = vmatpush3.bf16.msra.mxu1 %v2562_v5 }
 0x51d   : > { %v1885_v50 = vpop.xlane.xlu0 %1884 }
 0x51e   : > { %v1887_v44 = vmul.f32 0.03125, %v1885_v50 }
 0x520   : > { %v1888_v51 = vsub.f32 %v1882_v49, %v1887_v44 }
 0x522   : > { %v1889_v52 = vmul.f32 %v1888_v51, %v1888_v51 }
 0x524   : > { %v1890_v53 = vsel %vm634_vm1, %v1889_v52, 0.0 }
 0x525   : > { %1891 = vadd.xlane.f32.xlu1 %v1890_v53 }
 0x5ae   : > { %v1892_v57 = vpop.xlane.xlu1 %1891 }
 0x5af   : > { %v1893_v58 = vmul.f32 0.03125, %v1892_v57 }
 0x5b1   : > { %v1894_v59 = vadd.f32 1e-05, %v1893_v58 }
 0x5b3   : > { %2579 = vrsqrt.f32 %v1894_v59 }
 0x5c0   : > { %v2580_v60 = vpop.eup %2579 }
 0x5c1   : > { %v1896_v62 = vmul.f32 %v2580_v60, %v1888_v51 }
 0x5c3   : > { %v1903_v0 = vmul.f32 %v2218_v61, %v1896_v62 }
 0x5c5   : > { %v1910_v2 = vadd.f32 %v2219_v63, %v1903_v0 }
 0x5c7   : > { %v1911_v3 = vpack.c.bf16 %v1910_v2, %v1910_v2 }
 0x5c9   : > { %2477 = vmatmul.mubr.msk.bf16.vlgmr.msra.gmra.mxu0 %vm634_vm1, %v1911_v3 }
 0x689   : > { %v1967_v8 = vpop.f32.mrf.mxu0 }
 0x68a   : > { %v1968_v9 = vadd.f32 %v2220_v6, %v1967_v8 }
 0x68b   : > { %v2478_v10 = vpop.f32.mrf.mxu0 }
 0x68c   : > { %v1973_v11 = vmax.f32 %v1968_v9, 0.0 }
 0x68d   : > { %v1970_v12 = vpop.f32.mrf.mxu0 }
 0x68e   : > { %v1974_v13 = vpack.c.bf16 %v1973_v11, %v1973_v11 }
 0x68f   : > { %v2479_v14 = vpop.f32.mrf.mxu0 }
 0x690   : > { %2489 = vmatmul.mubr.msk.bf16.vlgmr.msra.gmra.mxu1 %vm2005_vm4, %v1974_v13 }
 0x750   : > { %v2043_v15 = vpop.f32.mrf.mxu1 }
 0x751   : > { %v2044_v16 = vadd.f32 %v2224_v1, %v2043_v15 }
 0x752   : > { %v2490_v17 = vpop.f32.mrf.mxu1 }
 0x753   : > { %v2049_v18 = vadd.f32 %v2044_v16, %v1910_v2 }
 0x754   : > { %v2046_v19 = vpop.f32.mrf.mxu1 }
 0x755   : > { %v2050_v20 = vsel %vm634_vm1, %v2049_v18, 0.0 }
 0x756   : > { %2051 = vadd.xlane.f32.xlu0 %v2050_v20  ;;  %v2491_v21 = vpop.f32.mrf.mxu1 }
 0x7df   : > { %v2052_v22 = vpop.xlane.xlu0 %2051 }
 0x7e0   : > { %v2053_v23 = vmul.f32 0.03125, %v2052_v22 }
 0x7e2   : > { %v2054_v24 = vsub.f32 %v2049_v18, %v2053_v23 }
 0x7e4   : > { %v2055_v25 = vmul.f32 %v2054_v24, %v2054_v24 }
 0x7e6   : > { %v2056_v26 = vsel %vm634_vm1, %v2055_v25, 0.0 }
 0x7e7   : > { %2057 = vadd.xlane.f32.xlu1 %v2056_v26 }
 0x870   : > { %v2058_v27 = vpop.xlane.xlu1 %2057 }
 0x871   : > { %v2059_v28 = vmul.f32 0.03125, %v2058_v27 }
 0x873   : > { %v2060_v29 = vadd.f32 1e-05, %v2059_v28 }
 0x875   : > { %2581 = vrsqrt.f32 %v2060_v29 }
 0x882   : > { %v2582_v30 = vpop.eup %2581 }
 0x883   : > { %v2062_v32 = vmul.f32 %v2582_v30, %v2054_v24 }
 0x885   : > { %v2069_v34 = vmul.f32 %v2230_v31, %v2062_v32 }
 0x887   : > { %v2076_v35 = vadd.f32 %v2231_v33, %v2069_v34 }
 0x889   : > { %2077 = vst.msk [vmem:[%s458_s22] sm:$0xff] %vm634_vm1, %v2076_v35 }
 0x88a   : > { %2596 = shalt.err (!%p2593_p3)
}
 0x88b   : > { %s2597_s0 = scalar_lea.hbm %s2090_s2, 128  ;;  %s2601_s27 = scalar_lea.hbm %s3159_s14, 256 }
 0x88c   : > { %p2598_p4 = scmp.ne.s32.totalorder %s2090_s2, %s2597_s0  ;;  %p2602_p9 = scmp.lt.s32.totalorder %s2090_s2, %s3159_s14 }
 0x88d   : > { %p2603_p10 = scmp.lt.s32.totalorder %s2601_s27, %s2597_s0 }
 0x88e   : > { %p2599_p7 = pnand %p2598_p4, %p2761_p5 }
 0x88f   : > { %p2604_p11 = por %p2603_p10, %p2602_p9 }
 0x890   : > { %p2600_p8 = pneg %p2599_p7 }
 0x892   : > { %p2605_p12 = pnand %p2604_p11, %p2600_p8 }
 0x894   : > { %2608 = shalt.err (!%p2605_p12)
}
 0x895   : > { %2492 = dma.vmem_to_hbm [thread:$0]  (%p2761_p5), %s2093_s26, 128, %s2090_s2, %s2079_s3  }
 0x896 PF: > { %p2498_p13 = scmp.ge.s32.totalorder %s2643_s16, 2  ;;  %s2104_s22 = sand.u32 1, %s2631_s29  }
 0x897   : > { %s2105_s28 = scalar_lea.sflag [#allocation3], %s2104_s22 }
 0x898   : > { %p2495_p0 = pnand %p2498_p13, %p2765_p6 }
 0x89a   : > { %p2496_p1 = pneg %p2495_p0 }
 0x89c   : > { %2626 = dma.done.wait (%p2496_p1), %s2105_s28, 128  }
 0x89d   : > { %2628 = vsyncadd (%p2496_p1), %s2105_s28, 4294967168  ;;  %s3173_s18 = sld [smem:[#allocation5_spill]]  ;;  %p24_p2 = scmp.ge.s32.totalorder %s2748_s19, 4  }
 0x89e   : > { %s3174_s15 = sld [smem:[#allocation6_spill]]  ;;  %s3175_s29 = smov %s2635_s30 }
 0x89f   : > { %s3177_s16 = smov %s2748_s19  ;;  %26 = sbr.rel (!%p24_p2) target bundleno = 8 (0x8), region = 111 }
 0x8a3   : > { %s3176_s30 = smov %s3173_s18 }
 0x8a4   :  { %2110 = vsyncpa [#allocation3], 1 }
 0x8a5   :  { %2112 = vsyncpa [#allocation3 + $0x1], 1 }

</bundles_post_ra>
